<compile_context>
chip_gen: v5e
topology: v5e:2x2
jax: 0.10.0
libtpu: 0.0.40
codegen_flags: <defaults>
</compile_context>

<pallas_src>
import functools

import jax
import jax.numpy as jnp
from jax.experimental import pallas as pl
from jax.experimental.pallas import tpu as pltpu


def vae_kernel(sa_ref, eps_ref,
               e_w1_ref, e_b1_ref, e_w2_ref, e_b2_ref,
               d_w1_ref, d_b1_ref, d_w2_ref, d_b2_ref,
               out_ref, xz_scratch,
               *, state_dim, action_dim, latent_dim):
    sa = sa_ref[...]                                           # (Bt, S+A)

    # --- Encoder: single matmul over the pre-concatenated input ----------
    h1 = jnp.dot(sa, e_w1_ref[...], preferred_element_type=jnp.float32)
    h1 = jnp.maximum(h1 + e_b1_ref[...], 0.0)                  # (Bt, H) ReLU

    stats = jnp.dot(h1, e_w2_ref[...],
                    preferred_element_type=jnp.float32) + e_b2_ref[...]   # (Bt, 2L)
    mean = stats[:, :latent_dim]                               # static lane slice
    log_std = stats[:, latent_dim:]
    std = jnp.exp(log_std)                                     # EUP

    # --- Reparameterization (noise supplied as an input) -----------------
    z = mean + std * eps_ref[...]                              # (Bt, L)

    # --- Decoder: build cat([state, z]) in VMEM scratch, single matmul ---
    xz_scratch[:, :state_dim] = sa[:, :state_dim]
    xz_scratch[:, state_dim:] = z
    h2 = jnp.dot(xz_scratch[...], d_w1_ref[...],
                 preferred_element_type=jnp.float32)
    h2 = jnp.maximum(h2 + d_b1_ref[...], 0.0)                  # (Bt, H) ReLU

    recon = jnp.tanh(jnp.dot(h2, d_w2_ref[...],
                             preferred_element_type=jnp.float32) + d_b2_ref[...])

    # --- Single output slab: recon || mean || std -------------------------
    out_ref[:, :action_dim] = recon.astype(out_ref.dtype)
    out_ref[:, action_dim:action_dim + latent_dim] = mean.astype(out_ref.dtype)
    out_ref[:, action_dim + latent_dim:] = std.astype(out_ref.dtype)


def vae_forward(state, action, eps, params):
    """Fused VAE forward. `eps` plays the role of torch.randn_like(std)."""
    e_w1, e_b1, e_w2, e_b2, d_w1, d_b1, d_w2, d_b2 = params
    B, S = state.shape
    A = action.shape[1]
    L = eps.shape[1]
    H = e_w1.shape[1]
    SA, SL = S + A, S + L

    # One fused (B, S+A) input instead of two -> one fewer DMA and the
    # torch.cat happens once at trace time.
    sa = jnp.concatenate([state, action], axis=1)

    # Batch tiling: weights stay VMEM-resident across tiles (constant
    # index_map); activation tiles auto double-buffer; parallel axis lets
    # v7x shard tiles across its two TensorCores.
    bt = 256 if (B % 256 == 0) else B
    grid = (B // bt,)

    act_spec = lambda shape: pl.BlockSpec(shape, lambda i: (i, 0))
    w_spec = lambda shape: pl.BlockSpec(shape, lambda i: (0, 0))

    flops = 2 * B * (SA * H + H * 2 * L + SL * H + H * A)
    transcendentals = B * (L + A)
    bytes_accessed = 4 * (B * SA + B * L + B * (A + 2 * L)
                          + SA * H + H + H * 2 * L + 2 * L
                          + SL * H + H + H * A + A)

    kernel = functools.partial(vae_kernel, state_dim=S, action_dim=A,
                               latent_dim=L)

    out = pl.pallas_call(
        kernel,
        out_shape=jax.ShapeDtypeStruct((B, A + 2 * L), jnp.float32),
        grid=grid,
        in_specs=[
            act_spec((bt, SA)),       # state||action
            act_spec((bt, L)),        # eps
            w_spec((SA, H)),          # e_w1
            w_spec((1, H)),           # e_b1
            w_spec((H, 2 * L)),       # e_w2
            w_spec((1, 2 * L)),       # e_b2
            w_spec((SL, H)),          # d_w1
            w_spec((1, H)),           # d_b1
            w_spec((H, A)),           # d_w2
            w_spec((1, A)),           # d_b2
        ],
        out_specs=act_spec((bt, A + 2 * L)),
        scratch_shapes=[pltpu.VMEM((bt, SL), jnp.float32)],
        compiler_params=pltpu.CompilerParams(
            dimension_semantics=("parallel",)),
        cost_estimate=pl.CostEstimate(flops=flops,
                                      transcendentals=transcendentals,
                                      bytes_accessed=bytes_accessed),
    )(
        sa, eps,
        e_w1, e_b1.reshape(1, H),
        e_w2, e_b2.reshape(1, 2 * L),
        d_w1, d_b1.reshape(1, H),
        d_w2, d_b2.reshape(1, A),
    )

    recon = out[:, :A]
    mean = out[:, A:A + L]
    std = out[:, A + L:]
    return recon, mean, std


def init_vae_params(key, state_dim, action_dim, latent_dim=32, hidden=256):
    """PyTorch nn.Linear default init: U(-1/sqrt(fan_in), 1/sqrt(fan_in)).
    Weights kept as (in, out) — the transpose of PyTorch's (out, in)."""
    keys = jax.random.split(key, 8)
    enc_in = state_dim + action_dim
    dec_in = state_dim + latent_dim

    def linear(kw, kb, d_in, d_out):
        bound = 1.0 / jnp.sqrt(d_in)
        w = jax.random.uniform(kw, (d_in, d_out), jnp.float32, -bound, bound)
        b = jax.random.uniform(kb, (d_out,), jnp.float32, -bound, bound)
        return w, b

    e_w1, e_b1 = linear(keys[0], keys[1], enc_in, hidden)
    e_w2, e_b2 = linear(keys[2], keys[3], hidden, latent_dim * 2)
    d_w1, d_b1 = linear(keys[4], keys[5], dec_in, hidden)
    d_w2, d_b2 = linear(keys[6], keys[7], hidden, action_dim)
    return (e_w1, e_b1, e_w2, e_b2, d_w1, d_b1, d_w2, d_b2)


if __name__ == "__main__":
    key = jax.random.PRNGKey(0)
    kp, ks, ka, ke = jax.random.split(key, 4)

    batch = 8
    state_dim = 16
    action_dim = 8
    latent_dim = 32

    params = init_vae_params(kp, state_dim, action_dim, latent_dim, hidden=256)
    state = jax.random.normal(ks, (batch, state_dim), jnp.float32)
    action = jax.random.normal(ka, (batch, action_dim), jnp.float32)
    # Noise generated host-side (equivalent to torch.randn_like) so the kernel
    # stays deterministic and checkable against the reference.
    eps = jax.random.normal(ke, (batch, latent_dim), jnp.float32)

    recon, mean, std = vae_forward(state, action, eps, params)
    jax.block_until_ready((recon, mean, std))

    # Pure-JAX reference of the same math (same eps).
    e_w1, e_b1, e_w2, e_b2, d_w1, d_b1, d_w2, d_b2 = params
    x = jnp.concatenate([state, action], axis=1)
    h1 = jnp.maximum(x @ e_w1 + e_b1, 0.0)
    stats = h1 @ e_w2 + e_b2
    mean_r, log_std_r = stats[:, :latent_dim], stats[:, latent_dim:]
    std_r = jnp.exp(log_std_r)
    z_r = mean_r + std_r * eps
    xz = jnp.concatenate([state, z_r], axis=1)
    h2 = jnp.maximum(xz @ d_w1 + d_b1, 0.0)
    recon_r = jnp.tanh(h2 @ d_w2 + d_b2)

    assert recon.shape == (batch, action_dim)
    assert mean.shape == (batch, latent_dim)
    assert std.shape == (batch, latent_dim)
    assert jnp.allclose(mean, mean_r, atol=1e-4, rtol=1e-4)
    assert jnp.allclose(std, std_r, atol=1e-4, rtol=1e-4)
    assert jnp.allclose(recon, recon_r, atol=1e-4, rtol=1e-4)

    print("KERNEL_OK")
</pallas_src>

<mosaic_0001>
module attributes {stable_mosaic.version = 11 : i64} {
  func.func @vae_kernel(%arg0: i32, %arg1: memref<8x24xf32, #tpu.memory_space<vmem>>, %arg2: memref<8x32xf32, #tpu.memory_space<vmem>>, %arg3: memref<24x256xf32, #tpu.memory_space<vmem>>, %arg4: memref<1x256xf32, #tpu.memory_space<vmem>>, %arg5: memref<256x64xf32, #tpu.memory_space<vmem>>, %arg6: memref<1x64xf32, #tpu.memory_space<vmem>>, %arg7: memref<48x256xf32, #tpu.memory_space<vmem>>, %arg8: memref<1x256xf32, #tpu.memory_space<vmem>>, %arg9: memref<256x8xf32, #tpu.memory_space<vmem>>, %arg10: memref<1x8xf32, #tpu.memory_space<vmem>>, %arg11: memref<8x72xf32, #tpu.memory_space<vmem>>, %arg12: memref<8x48xf32, #tpu.memory_space<vmem>>) attributes {dimension_semantics = [#tpu.dimension_semantics<parallel>], iteration_bounds = array<i64: 1>, scalar_prefetch = 0 : i64, scratch_operands = 1 : i64, tpu.core_type = #tpu.core_type<tc>, window_params = [{transform_indices = @transform_0, window_bounds = array<i64: 8, 24>}, {transform_indices = @transform_1, window_bounds = array<i64: 8, 32>}, {pipeline_mode = #tpu.pipeline_mode<synchronous>, transform_indices = @transform_2, window_bounds = array<i64: 24, 256>}, {pipeline_mode = #tpu.pipeline_mode<synchronous>, transform_indices = @transform_3, window_bounds = array<i64: 1, 256>}, {pipeline_mode = #tpu.pipeline_mode<synchronous>, transform_indices = @transform_4, window_bounds = array<i64: 256, 64>}, {pipeline_mode = #tpu.pipeline_mode<synchronous>, transform_indices = @transform_5, window_bounds = array<i64: 1, 64>}, {pipeline_mode = #tpu.pipeline_mode<synchronous>, transform_indices = @transform_6, window_bounds = array<i64: 48, 256>}, {pipeline_mode = #tpu.pipeline_mode<synchronous>, transform_indices = @transform_7, window_bounds = array<i64: 1, 256>}, {pipeline_mode = #tpu.pipeline_mode<synchronous>, transform_indices = @transform_8, window_bounds = array<i64: 256, 8>}, {pipeline_mode = #tpu.pipeline_mode<synchronous>, transform_indices = @transform_9, window_bounds = array<i64: 1, 8>}, {transform_indices = @transform_10, window_bounds = array<i64: 8, 72>}]} {
    %c0 = arith.constant 0 : index
    %c0_0 = arith.constant 0 : index
    %0 = vector.load %arg1[%c0, %c0_0] : memref<8x24xf32, #tpu.memory_space<vmem>>, vector<8x24xf32>
    %c0_1 = arith.constant 0 : index
    %c0_2 = arith.constant 0 : index
    %1 = vector.load %arg3[%c0_1, %c0_2] : memref<24x256xf32, #tpu.memory_space<vmem>>, vector<24x256xf32>
    %cst = arith.constant dense<0.000000e+00> : vector<8x256xf32>
    %2 = tpu.matmul %0, %1, %cst {dimension_numbers = #tpu.dot_dimension_numbers<[1], [0], [0], [1], [0, 0, 1, 1], [], []>} : vector<8x24xf32>, vector<24x256xf32>, vector<8x256xf32> -> vector<8x256xf32>
    %c0_3 = arith.constant 0 : index
    %c0_4 = arith.constant 0 : index
    %3 = vector.load %arg4[%c0_3, %c0_4] : memref<1x256xf32, #tpu.memory_space<vmem>>, vector<1x256xf32>
    %4 = vector.broadcast %3 : vector<1x256xf32> to vector<8x256xf32>
    %5 = arith.addf %2, %4 : vector<8x256xf32>
    %cst_5 = arith.constant 0.000000e+00 : f32
    %6 = vector.broadcast %cst_5 : f32 to vector<8x256xf32>
    %7 = arith.maximumf %5, %6 : vector<8x256xf32>
    %c0_6 = arith.constant 0 : index
    %c0_7 = arith.constant 0 : index
    %8 = vector.load %arg5[%c0_6, %c0_7] : memref<256x64xf32, #tpu.memory_space<vmem>>, vector<256x64xf32>
    %cst_8 = arith.constant dense<0.000000e+00> : vector<8x64xf32>
    %9 = tpu.matmul %7, %8, %cst_8 {dimension_numbers = #tpu.dot_dimension_numbers<[1], [0], [0], [1], [0, 0, 1, 1], [], []>} : vector<8x256xf32>, vector<256x64xf32>, vector<8x64xf32> -> vector<8x64xf32>
    %c0_9 = arith.constant 0 : index
    %c0_10 = arith.constant 0 : index
    %10 = vector.load %arg6[%c0_9, %c0_10] : memref<1x64xf32, #tpu.memory_space<vmem>>, vector<1x64xf32>
    %11 = vector.broadcast %10 : vector<1x64xf32> to vector<8x64xf32>
    %12 = arith.addf %9, %11 : vector<8x64xf32>
    %13 = vector.extract_strided_slice %12 {offsets = [0, 0], sizes = [8, 32], strides = [1, 1]} : vector<8x64xf32> to vector<8x32xf32>
    %14 = vector.extract_strided_slice %12 {offsets = [0, 32], sizes = [8, 32], strides = [1, 1]} : vector<8x64xf32> to vector<8x32xf32>
    %15 = math.exp %14 : vector<8x32xf32>
    %c0_11 = arith.constant 0 : index
    %c0_12 = arith.constant 0 : index
    %16 = vector.load %arg2[%c0_11, %c0_12] : memref<8x32xf32, #tpu.memory_space<vmem>>, vector<8x32xf32>
    %17 = arith.mulf %15, %16 : vector<8x32xf32>
    %18 = arith.addf %13, %17 : vector<8x32xf32>
    %19 = vector.extract_strided_slice %0 {offsets = [0, 0], sizes = [8, 16], strides = [1, 1]} : vector<8x24xf32> to vector<8x16xf32>
    %c0_13 = arith.constant 0 : index
    %c0_14 = arith.constant 0 : index
    %20 = vector.load %arg12[%c0_13, %c0_14] : memref<8x48xf32, #tpu.memory_space<vmem>>, vector<8x16xf32>
    tpu.vector_store %arg12[%c0_13, %c0_14], %19 {strides = array<i32>} : memref<8x48xf32, #tpu.memory_space<vmem>>, vector<8x16xf32>,
    %c0_15 = arith.constant 0 : index
    %c16 = arith.constant 16 : index
    %21 = vector.load %arg12[%c0_15, %c16] : memref<8x48xf32, #tpu.memory_space<vmem>>, vector<8x32xf32>
    tpu.vector_store %arg12[%c0_15, %c16], %18 {strides = array<i32>} : memref<8x48xf32, #tpu.memory_space<vmem>>, vector<8x32xf32>,
    %c0_16 = arith.constant 0 : index
    %c0_17 = arith.constant 0 : index
    %22 = vector.load %arg12[%c0_16, %c0_17] : memref<8x48xf32, #tpu.memory_space<vmem>>, vector<8x48xf32>
    %c0_18 = arith.constant 0 : index
    %c0_19 = arith.constant 0 : index
    %23 = vector.load %arg7[%c0_18, %c0_19] : memref<48x256xf32, #tpu.memory_space<vmem>>, vector<48x256xf32>
    %cst_20 = arith.constant dense<0.000000e+00> : vector<8x256xf32>
    %24 = tpu.matmul %22, %23, %cst_20 {dimension_numbers = #tpu.dot_dimension_numbers<[1], [0], [0], [1], [0, 0, 1, 1], [], []>} : vector<8x48xf32>, vector<48x256xf32>, vector<8x256xf32> -> vector<8x256xf32>
    %c0_21 = arith.constant 0 : index
    %c0_22 = arith.constant 0 : index
    %25 = vector.load %arg8[%c0_21, %c0_22] : memref<1x256xf32, #tpu.memory_space<vmem>>, vector<1x256xf32>
    %26 = vector.broadcast %25 : vector<1x256xf32> to vector<8x256xf32>
    %27 = arith.addf %24, %26 : vector<8x256xf32>
    %cst_23 = arith.constant 0.000000e+00 : f32
    %28 = vector.broadcast %cst_23 : f32 to vector<8x256xf32>
    %29 = arith.maximumf %27, %28 : vector<8x256xf32>
    %c0_24 = arith.constant 0 : index
    %c0_25 = arith.constant 0 : index
    %30 = vector.load %arg9[%c0_24, %c0_25] : memref<256x8xf32, #tpu.memory_space<vmem>>, vector<256x8xf32>
    %cst_26 = arith.constant dense<0.000000e+00> : vector<8x8xf32>
    %31 = tpu.matmul %29, %30, %cst_26 {dimension_numbers = #tpu.dot_dimension_numbers<[1], [0], [0], [1], [0, 0, 1, 1], [], []>} : vector<8x256xf32>, vector<256x8xf32>, vector<8x8xf32> -> vector<8x8xf32>
    %c0_27 = arith.constant 0 : index
    %c0_28 = arith.constant 0 : index
    %32 = vector.load %arg10[%c0_27, %c0_28] : memref<1x8xf32, #tpu.memory_space<vmem>>, vector<1x8xf32>
    %33 = vector.broadcast %32 : vector<1x8xf32> to vector<8x8xf32>
    %34 = arith.addf %31, %33 : vector<8x8xf32>
    %35 = math.tanh %34 : vector<8x8xf32>
    %c0_29 = arith.constant 0 : index
    %c0_30 = arith.constant 0 : index
    %36 = vector.load %arg11[%c0_29, %c0_30] : memref<8x72xf32, #tpu.memory_space<vmem>>, vector<8x8xf32>
    tpu.vector_store %arg11[%c0_29, %c0_30], %35 {strides = array<i32>} : memref<8x72xf32, #tpu.memory_space<vmem>>, vector<8x8xf32>,
    %c0_31 = arith.constant 0 : index
    %c8 = arith.constant 8 : index
    %37 = vector.load %arg11[%c0_31, %c8] : memref<8x72xf32, #tpu.memory_space<vmem>>, vector<8x32xf32>
    tpu.vector_store %arg11[%c0_31, %c8], %13 {strides = array<i32>} : memref<8x72xf32, #tpu.memory_space<vmem>>, vector<8x32xf32>,
    %c0_32 = arith.constant 0 : index
    %c40 = arith.constant 40 : index
    %38 = vector.load %arg11[%c0_32, %c40] : memref<8x72xf32, #tpu.memory_space<vmem>>, vector<8x32xf32>
    tpu.vector_store %arg11[%c0_32, %c40], %15 {strides = array<i32>} : memref<8x72xf32, #tpu.memory_space<vmem>>, vector<8x32xf32>,
    return
  }
  func.func @transform_0(%arg0: i32) -> (i32, i32) {
    %c0_i32 = arith.constant 0 : i32
    %c0_i32_0 = arith.constant 0 : i32
    return %arg0, %c0_i32 : i32, i32
  }
  func.func @transform_1(%arg0: i32) -> (i32, i32) {
    %c0_i32 = arith.constant 0 : i32
    %c0_i32_0 = arith.constant 0 : i32
    return %arg0, %c0_i32 : i32, i32
  }
  func.func @transform_2(%arg0: i32) -> (i32, i32) {
    %c0_i32 = arith.constant 0 : i32
    %c0_i32_0 = arith.constant 0 : i32
    %c0_i32_1 = arith.constant 0 : i32
    return %c0_i32, %c0_i32_0 : i32, i32
  }
  func.func @transform_3(%arg0: i32) -> (i32, i32) {
    %c0_i32 = arith.constant 0 : i32
    %c0_i32_0 = arith.constant 0 : i32
    %c0_i32_1 = arith.constant 0 : i32
    return %c0_i32, %c0_i32_0 : i32, i32
  }
  func.func @transform_4(%arg0: i32) -> (i32, i32) {
    %c0_i32 = arith.constant 0 : i32
    %c0_i32_0 = arith.constant 0 : i32
    %c0_i32_1 = arith.constant 0 : i32
    return %c0_i32, %c0_i32_0 : i32, i32
  }
  func.func @transform_5(%arg0: i32) -> (i32, i32) {
    %c0_i32 = arith.constant 0 : i32
    %c0_i32_0 = arith.constant 0 : i32
    %c0_i32_1 = arith.constant 0 : i32
    return %c0_i32, %c0_i32_0 : i32, i32
  }
  func.func @transform_6(%arg0: i32) -> (i32, i32) {
    %c0_i32 = arith.constant 0 : i32
    %c0_i32_0 = arith.constant 0 : i32
    %c0_i32_1 = arith.constant 0 : i32
    return %c0_i32, %c0_i32_0 : i32, i32
  }
  func.func @transform_7(%arg0: i32) -> (i32, i32) {
    %c0_i32 = arith.constant 0 : i32
    %c0_i32_0 = arith.constant 0 : i32
    %c0_i32_1 = arith.constant 0 : i32
    return %c0_i32, %c0_i32_0 : i32, i32
  }
  func.func @transform_8(%arg0: i32) -> (i32, i32) {
    %c0_i32 = arith.constant 0 : i32
    %c0_i32_0 = arith.constant 0 : i32
    %c0_i32_1 = arith.constant 0 : i32
    return %c0_i32, %c0_i32_0 : i32, i32
  }
  func.func @transform_9(%arg0: i32) -> (i32, i32) {
    %c0_i32 = arith.constant 0 : i32
    %c0_i32_0 = arith.constant 0 : i32
    %c0_i32_1 = arith.constant 0 : i32
    return %c0_i32, %c0_i32_0 : i32, i32
  }
  func.func @transform_10(%arg0: i32) -> (i32, i32) {
    %c0_i32 = arith.constant 0 : i32
    %c0_i32_0 = arith.constant 0 : i32
    return %arg0, %c0_i32 : i32, i32
  }
}

</mosaic_0001>

<bundles_post_ra>
// kernel: tpu_custom_call.1
= control target key start
LH: loop header
LB: loop body
LE: loop exit
PB: predicated region body
PF: predicated region fallthrough
CT: control target
= control target key end

     0   :  { %vm49_vm0 = vcmask 195584   ;;  %s737_s0 = inlined_call_operand.vmem [shape: f32[8,24], index: 0, kind: input, shape index: {}]   ;;  %s738_s1 = inlined_call_operand.vmem [shape: f32[8,32], index: 1, kind: input, shape index: {}]   ;;  %s739_s2 = inlined_call_operand.vmem [shape: f32[24,256], index: 2, kind: input, shape index: {}]   ;;  %s740_s3 = inlined_call_operand.vmem [shape: f32[1,256], index: 3, kind: input, shape index: {}]   ;;  %s741_s4 = inlined_call_operand.vmem [shape: f32[256,64], index: 4, kind: input, shape index: {}]   ;;  %s742_s5 = inlined_call_operand.vmem [shape: f32[1,64], index: 5, kind: input, shape index: {}]   ;;  %s743_s6 = inlined_call_operand.vmem [shape: f32[48,256], index: 6, kind: input, shape index: {}]   ;;  %s744_s7 = inlined_call_operand.vmem [shape: f32[1,256], index: 7, kind: input, shape index: {}]   ;;  %s745_s8 = inlined_call_operand.vmem [shape: f32[256,8], index: 8, kind: input, shape index: {}]   ;;  %s746_s9 = inlined_call_operand.vmem [shape: f32[1,8], index: 9, kind: input, shape index: {}]   ;;  %s747_s10 = inlined_call_operand.hbm [shape: f32[8,72], index: 10, kind: output, shape index: {}]  }
   0x1   :  { %v41_v0 = vld [vmem:[%s739_s2 + $0x20] sm:$0xff]  ;;  %v39_v1 = vld [vmem:[%s739_s2 + $0x10] sm:$0xff]  ;;  %v42_v2 = vld [vmem:[%s739_s2 + $0x28] sm:$0xff] }
   0x2   :  { %66 = vmatpush.msra.mxu2 %v41_v0  ;;  %86 = vmatpush.msra.mxu3 %v42_v2  ;;  %v40_v3 = vld [vmem:[%s739_s2 + $0x18] sm:$0xff]  ;;  %v37_v4 = vld [vmem:[%s739_s2] sm:$0xff]  ;;  %v38_v5 = vld [vmem:[%s739_s2 + $0x8] sm:$0xff] }
   0x3   :  { %v486_v6 = vld [vmem:[%s737_s0] sm:$0xff]  ;;  %v110_v7 = vld [vmem:[%s741_s4 + $0x78] sm:$0xff]  ;;  %v109_v9 = vld [vmem:[%s741_s4 + $0x70] sm:$0xff] }
   0x4   :  { %67 = vmatpush.msra.mxu2 %v39_v1  ;;  %87 = vmatpush.msra.mxu3 %v40_v3  ;;  %v126_v8 = vld [vmem:[%s741_s4 + $0xf8] sm:$0xff]  ;;  %v125_v10 = vld [vmem:[%s741_s4 + $0xf0] sm:$0xff]  ;;  %v108_v11 = vld [vmem:[%s741_s4 + $0x68] sm:$0xff] }
   0x5   :  { %v124_v12 = vld [vmem:[%s741_s4 + $0xe8] sm:$0xff]  ;;  %v107_v13 = vld [vmem:[%s741_s4 + $0x60] sm:$0xff]  ;;  %v106_v15 = vld [vmem:[%s741_s4 + $0x58] sm:$0xff] }
   0x6   :  { %68 = vmatpush.msra.mxu2 %v37_v4  ;;  %88 = vmatpush.msra.mxu3 %v38_v5  ;;  %v123_v14 = vld [vmem:[%s741_s4 + $0xe0] sm:$0xff]  ;;  %v122_v16 = vld [vmem:[%s741_s4 + $0xd8] sm:$0xff] }
   0x7   :  { %364 = vmatmul.msk.f32.vlgmr.msra.gmra.mxu2 %vm49_vm0, %v486_v6  ;;  %365 = vmatmul.msk.f32.vlgmr.msra.gmra.mxu3 %vm49_vm0, %v486_v6 }
   0x8   :  { %131 = vmatpush.msrb.mxu2 %v110_v7  ;;  %151 = vmatpush.msrb.mxu3 %v126_v8 }
   0xa   :  { %132 = vmatpush.msrb.mxu2 %v109_v9  ;;  %152 = vmatpush.msrb.mxu3 %v125_v10 }
   0xc   :  { %133 = vmatpush.msrb.mxu2 %v108_v11  ;;  %153 = vmatpush.msrb.mxu3 %v124_v12 }
   0xd   :  { %15 = vsyncpa [#allocation4], 0  ;;  %v105_v17 = vld [vmem:[%s741_s4 + $0x50] sm:$0xff]  ;;  %v104_v19 = vld [vmem:[%s741_s4 + $0x48] sm:$0xff]  ;;  %s405_s27 = smov 32   ;;  %vm184_vm1 = vcmask 130048  }
   0xe   :  { %134 = vmatpush.msrb.mxu2 %v107_v13  ;;  %154 = vmatpush.msrb.mxu3 %v123_v14  ;;  %v121_v18 = vld [vmem:[%s741_s4 + $0xd0] sm:$0xff]  ;;  %v120_v20 = vld [vmem:[%s741_s4 + $0xc8] sm:$0xff]  ;;  %v103_v21 = vld [vmem:[%s741_s4 + $0x40] sm:$0xff]  ;;  %185 = vst.msk [vmem:[#allocation2] sm:$0xff] %vm184_vm1, %v486_v6  ;;  %s408_s16 = smov 16   ;;  %vm190_vm2 = vcmask 392320  }
   0xf   :  { %v119_v22 = vld [vmem:[%s741_s4 + $0xc0] sm:$0xff]  ;;  %v102_v23 = vld [vmem:[%s741_s4 + $0x38] sm:$0xff]  ;;  %v101_v25 = vld [vmem:[%s741_s4 + $0x30] sm:$0xff]  ;;  %vm211_vm3 = vcmask 392192   ;;  %vm334_vm4 = vcmask 64512   ;;  %s355_s22 = sshll.u32 %s747_s10, 4  ;;  %s356_s22 = int_to_ptr.hbm [resolvable:$true] %s355_s22 }
  0x10   :  { %135 = vmatpush.msrb.mxu2 %v106_v15  ;;  %155 = vmatpush.msrb.mxu3 %v122_v16  ;;  %v118_v24 = vld [vmem:[%s741_s4 + $0xb8] sm:$0xff]  ;;  %v117_v26 = vld [vmem:[%s741_s4 + $0xb0] sm:$0xff]  ;;  %v100_v27 = vld [vmem:[%s741_s4 + $0x28] sm:$0xff]  ;;  %vm340_vm5 = vcmask 326720   ;;  %vm346_vm6 = vcmask 589120  }
  0x11   :  { %v116_v28 = vld [vmem:[%s741_s4 + $0xa8] sm:$0xff]  ;;  %v99_v29 = vld [vmem:[%s741_s4 + $0x20] sm:$0xff]  ;;  %v98_v31 = vld [vmem:[%s741_s4 + $0x18] sm:$0xff] }
  0x12   :  { %136 = vmatpush.msrb.mxu2 %v105_v17  ;;  %156 = vmatpush.msrb.mxu3 %v121_v18  ;;  %v115_v30 = vld [vmem:[%s741_s4 + $0xa0] sm:$0xff]  ;;  %v97_v32 = vld [vmem:[%s741_s4 + $0x10] sm:$0xff]  ;;  %v114_v33 = vld [vmem:[%s741_s4 + $0x98] sm:$0xff] }
  0x13   :  { %v96_v34 = vld [vmem:[%s741_s4 + $0x8] sm:$0xff]  ;;  %v113_v35 = vld [vmem:[%s741_s4 + $0x90] sm:$0xff]  ;;  %v95_v36 = vld [vmem:[%s741_s4] sm:$0xff] }
  0x14   :  { %137 = vmatpush.msrb.mxu2 %v104_v19  ;;  %157 = vmatpush.msrb.mxu3 %v120_v20  ;;  %v112_v37 = vld [vmem:[%s741_s4 + $0x88] sm:$0xff]  ;;  %v111_v38 = vld [vmem:[%s741_s4 + $0x80] sm:$0xff]  ;;  %v203_v58 = vld [vmem:[%s743_s6 + $0x50] sm:$0xff] }
  0x15   :  { %v173_v39 = vld [vmem:[%s738_s1] sm:$0xff]  ;;  %s406_s1 = smov 8   ;;  %v204_v59 = vld [vmem:[%s743_s6 + $0x58] sm:$0xff]  ;;  %225 = vmatpush.msra.mxu0 %v203_v58  ;;  %v202_v61 = vld [vmem:[%s743_s6 + $0x48] sm:$0xff] }
  0x16   :  { %138 = vmatpush.msrb.mxu2 %v103_v21  ;;  %158 = vmatpush.msrb.mxu3 %v119_v22  ;;  %v43_v40 = vld [vmem:[%s740_s3] sm:$0x3]  ;;  %s407_s3 = smov 96   ;;  %v199_v0 = vld [vmem:[%s743_s6 + $0x30] sm:$0xff]  ;;  %v200_v1 = vld [vmem:[%s743_s6 + $0x38] sm:$0xff] }
  0x17   :  { %175 = vrot.lane.b32.xlu0 %v173_v39, %s405_s27  ;;  %v45_v41 = vperm.slane %v43_v40, 0  ;;  %v46_v42 = vperm.slane %v43_v40, 1  ;;  %v373_v49 = vld [vmem:[%s742_s5] ss:$0 sm:$0xff]  ;;  %245 = vmatpush.msra.mxu1 %v204_v59  ;;  %v198_v3 = vld [vmem:[%s743_s6 + $0x28] sm:$0xff]  ;;  %v195_v4 = vld [vmem:[%s743_s6 + $0x10] sm:$0xff] }
  0x18   :  { %139 = vmatpush.msrb.mxu2 %v102_v23  ;;  %159 = vmatpush.msrb.mxu3 %v118_v24  ;;  %v201_v60 = vld [vmem:[%s743_s6 + $0x40] sm:$0xff]  ;;  %v196_v5 = vld [vmem:[%s743_s6 + $0x18] sm:$0xff]  ;;  %v194_v7 = vld [vmem:[%s743_s6 + $0x8] sm:$0xff] }
  0x19   :  { %226 = vmatpush.msra.mxu0 %v201_v60  ;;  %246 = vmatpush.msra.mxu1 %v202_v61  ;;  %v197_v2 = vld [vmem:[%s743_s6 + $0x20] sm:$0xff]  ;;  %v272_v8 = vld [vmem:[%s745_s8 + $0x78] sm:$0xff]  ;;  %v271_v10 = vld [vmem:[%s745_s8 + $0x70] sm:$0xff] }
  0x1a   :  { %140 = vmatpush.msrb.mxu2 %v101_v25  ;;  %160 = vmatpush.msrb.mxu3 %v117_v26  ;;  %v193_v6 = vld [vmem:[%s743_s6] sm:$0xff]  ;;  %v288_v9 = vld [vmem:[%s745_s8 + $0xf8] sm:$0xff]  ;;  %v287_v11 = vld [vmem:[%s745_s8 + $0xf0] sm:$0xff] }
  0x1b   :  { %227 = vmatpush.msra.mxu0 %v199_v0  ;;  %247 = vmatpush.msra.mxu1 %v200_v1  ;;  %v270_v12 = vld [vmem:[%s745_s8 + $0x68] sm:$0xff]  ;;  %v269_v14 = vld [vmem:[%s745_s8 + $0x60] sm:$0xff]  ;;  %v268_v16 = vld [vmem:[%s745_s8 + $0x58] sm:$0xff] }
  0x1c   :  { %141 = vmatpush.msrb.mxu2 %v100_v27  ;;  %161 = vmatpush.msrb.mxu3 %v116_v28  ;;  %v286_v13 = vld [vmem:[%s745_s8 + $0xe8] sm:$0xff]  ;;  %v285_v15 = vld [vmem:[%s745_s8 + $0xe0] sm:$0xff]  ;;  %v284_v17 = vld [vmem:[%s745_s8 + $0xd8] sm:$0xff] }
  0x1d   :  { %228 = vmatpush.msra.mxu0 %v197_v2  ;;  %248 = vmatpush.msra.mxu1 %v198_v3  ;;  %v267_v18 = vld [vmem:[%s745_s8 + $0x50] sm:$0xff]  ;;  %v266_v20 = vld [vmem:[%s745_s8 + $0x48] sm:$0xff]  ;;  %v265_v22 = vld [vmem:[%s745_s8 + $0x40] sm:$0xff] }
  0x1e   :  { %142 = vmatpush.msrb.mxu2 %v99_v29  ;;  %162 = vmatpush.msrb.mxu3 %v115_v30  ;;  %v283_v19 = vld [vmem:[%s745_s8 + $0xd0] sm:$0xff]  ;;  %v282_v21 = vld [vmem:[%s745_s8 + $0xc8] sm:$0xff]  ;;  %v281_v23 = vld [vmem:[%s745_s8 + $0xc0] sm:$0xff] }
  0x1f   :  { %229 = vmatpush.msra.mxu0 %v195_v4  ;;  %249 = vmatpush.msra.mxu1 %v196_v5  ;;  %v264_v24 = vld [vmem:[%s745_s8 + $0x38] sm:$0xff]  ;;  %v263_v26 = vld [vmem:[%s745_s8 + $0x30] sm:$0xff]  ;;  %v262_v28 = vld [vmem:[%s745_s8 + $0x28] sm:$0xff] }
  0x20   :  { %143 = vmatpush.msrb.mxu2 %v98_v31  ;;  %163 = vmatpush.msrb.mxu3 %v114_v33  ;;  %v280_v25 = vld [vmem:[%s745_s8 + $0xb8] sm:$0xff]  ;;  %v279_v27 = vld [vmem:[%s745_s8 + $0xb0] sm:$0xff]  ;;  %v278_v29 = vld [vmem:[%s745_s8 + $0xa8] sm:$0xff] }
  0x21   :  { %230 = vmatpush.msra.mxu0 %v193_v6  ;;  %250 = vmatpush.msra.mxu1 %v194_v7  ;;  %v261_v30 = vld [vmem:[%s745_s8 + $0x20] sm:$0xff]  ;;  %v276_v33 = vld [vmem:[%s745_s8 + $0x98] sm:$0xff]  ;;  %v274_v39 = vld [vmem:[%s745_s8 + $0x88] sm:$0xff] }
  0x22   :  { %144 = vmatpush.msrb.mxu2 %v97_v32  ;;  %164 = vmatpush.msrb.mxu3 %v113_v35  ;;  %v277_v31 = vld [vmem:[%s745_s8 + $0xa0] sm:$0xff]  ;;  %v260_v32 = vld [vmem:[%s745_s8 + $0x18] sm:$0xff] }
  0x23   :  { %293 = vmatpush.msrb.mxu0 %v272_v8  ;;  %313 = vmatpush.msrb.mxu1 %v288_v9  ;;  %v257_v40 = vld [vmem:[%s745_s8] sm:$0xff] }
  0x24   :  { %145 = vmatpush.msrb.mxu2 %v96_v34  ;;  %165 = vmatpush.msrb.mxu3 %v112_v37  ;;  %v275_v37 = vld [vmem:[%s745_s8 + $0x90] sm:$0xff] }
  0x25   :  { %294 = vmatpush.msrb.mxu0 %v271_v10  ;;  %314 = vmatpush.msrb.mxu1 %v287_v11 }
  0x26   :  { %146 = vmatpush.msrb.mxu2 %v95_v36  ;;  %166 = vmatpush.msrb.mxu3 %v111_v38  ;;  %v259_v36 = vld [vmem:[%s745_s8 + $0x10] sm:$0xff]  ;;  %v258_v38 = vld [vmem:[%s745_s8 + $0x8] sm:$0xff] }
  0x27   :  { %295 = vmatpush.msrb.mxu0 %v270_v12  ;;  %315 = vmatpush.msrb.mxu1 %v286_v13 }
  0x29   :  { %296 = vmatpush.msrb.mxu0 %v269_v14  ;;  %316 = vmatpush.msrb.mxu1 %v285_v15 }
  0x2b   :  { %297 = vmatpush.msrb.mxu0 %v268_v16  ;;  %317 = vmatpush.msrb.mxu1 %v284_v17 }
  0x2d   :  { %298 = vmatpush.msrb.mxu0 %v267_v18  ;;  %318 = vmatpush.msrb.mxu1 %v283_v19 }
  0x2f   :  { %299 = vmatpush.msrb.mxu0 %v266_v20  ;;  %319 = vmatpush.msrb.mxu1 %v282_v21 }
  0x31   :  { %300 = vmatpush.msrb.mxu0 %v265_v22  ;;  %320 = vmatpush.msrb.mxu1 %v281_v23 }
  0x33   :  { %301 = vmatpush.msrb.mxu0 %v264_v24  ;;  %321 = vmatpush.msrb.mxu1 %v280_v25 }
  0x35   :  { %302 = vmatpush.msrb.mxu0 %v263_v26  ;;  %322 = vmatpush.msrb.mxu1 %v279_v27 }
  0x37   :  { %303 = vmatpush.msrb.mxu0 %v262_v28  ;;  %323 = vmatpush.msrb.mxu1 %v278_v29 }
  0x39   :  { %304 = vmatpush.msrb.mxu0 %v261_v30  ;;  %324 = vmatpush.msrb.mxu1 %v277_v31 }
  0x3b   :  { %305 = vmatpush.msrb.mxu0 %v260_v32  ;;  %325 = vmatpush.msrb.mxu1 %v276_v33 }
  0x3d   :  { %306 = vmatpush.msrb.mxu0 %v259_v36  ;;  %326 = vmatpush.msrb.mxu1 %v275_v37 }
  0x3f   :  { %307 = vmatpush.msrb.mxu0 %v258_v38  ;;  %327 = vmatpush.msrb.mxu1 %v274_v39 }
  0x41   :  { %308 = vmatpush.msrb.mxu0 %v257_v40 }
  0x89   :  { %v176_v55 = vpop.permute.xlu0 %175 }
  0x8a   :  { %v70_v43 = vpop.f32.mrf.mxu2  ;;  %v90_v44 = vpop.f32.mrf.mxu3 }
  0x8b   :  { %v71_v45 = vadd.f32 %v70_v43, %v45_v41  ;;  %v91_v46 = vadd.f32 %v90_v44, %v46_v42  ;;  %v273_v41 = vld [vmem:[%s745_s8 + $0x80] sm:$0xff] }
  0x8c   :  { %328 = vmatpush.msrb.mxu1 %v273_v41  ;;  %v205_v42 = vld [vmem:[%s744_s7] sm:$0x3]  ;;  %s409_s7 = smov [#allocation3]  }
  0x8d   :  { %v93_v47 = vmax.f32 %v71_v45, 0.0  ;;  %v94_v48 = vmax.f32 %v91_v46, 0.0  ;;  %v207_v43 = vperm.slane %v205_v42, 0  ;;  %v208_v44 = vperm.slane %v205_v42, 1  ;;  %s353_s8 = sshll.u32 %s409_s7, 4  ;;  %s354_s8 = int_to_ptr.vmem [resolvable:$true] %s353_s8 }
  0x8f   :  { %147 = vmatmul.f32.vlgmr.msrb.gmra.mxu2 %v93_v47  ;;  %167 = vmatmul.f32.vlgmr.msrb.gmra.mxu3 %v94_v48 }
 0x112   :  { %v148_v50 = vpop.f32.mrf.mxu2  ;;  %v168_v51 = vpop.f32.mrf.mxu3 }
 0x113   :  { %v149_v52 = vadd.f32 %v373_v49, %v148_v50 }
 0x115   :  { %v169_v53 = vadd.f32 %v168_v51, %v149_v52  ;;  %v374_v51 = vld [vmem:[%s746_s9] ss:$0 sm:$0xff] }
 0x117   :  { %v171_v54 = vmul.f32 1.442695, %v169_v53 }
 0x119   :  { %375 = vpow2.f32 %v171_v54 }
 0x11f   :  { %v376_v56 = vpop.eup %375 }
 0x120   :  { %v178_v57 = vmul.f32 %v376_v56, %v176_v55  ;;  %343 = vrot.lane.b32.xlu2 %v376_v56, %s406_s1 }
 0x122   :  { %180 = vrot.lane.b32.xlu0 %v178_v57, %s407_s3 }
 0x17a   :  { %v344_v58 = vpop.permute.xlu2 %343 }
 0x194   :  { %v181_v62 = vpop.permute.xlu0 %180 }
 0x195   :  { %v183_v63 = vadd.f32 %v181_v62, %v169_v53 }
 0x197   :  { %187 = vrot.lane.b32.xlu1 %v183_v63, %s408_s16 }
 0x19f   :  { %337 = vrot.lane.b32.xlu1 %v169_v53, %s406_s1 }
 0x209   :  { %v188_v34 = vpop.permute.xlu1 %187 }
 0x20a   :  { %191 = vst.msk [vmem:[#allocation2] sm:$0xff] %vm190_vm2, %v188_v34 }
 0x211   :  { %v192_v35 = vld [vmem:[#allocation2] sm:$0xff]  ;;  %v338_v57 = vpop.permute.xlu1 %337 }
 0x212   :  { %366 = vmatmul.msk.f32.vlgmr.msra.gmra.mxu0 %vm211_vm3, %v192_v35  ;;  %367 = vmatmul.msk.f32.vlgmr.msra.gmra.mxu1 %vm211_vm3, %v192_v35 }
 0x28f   :  { %v232_v45 = vpop.f32.mrf.mxu0  ;;  %v252_v46 = vpop.f32.mrf.mxu1 }
 0x290   :  { %v233_v47 = vadd.f32 %v232_v45, %v207_v43  ;;  %v253_v48 = vadd.f32 %v252_v46, %v208_v44 }
 0x292   :  { %v255_v49 = vmax.f32 %v233_v47, 0.0  ;;  %v256_v50 = vmax.f32 %v253_v48, 0.0 }
 0x294   :  { %309 = vmatmul.f32.vlgmr.msrb.gmra.mxu0 %v255_v49  ;;  %329 = vmatmul.f32.vlgmr.msrb.gmra.mxu1 %v256_v50 }
 0x311   :  { %v310_v52 = vpop.f32.mrf.mxu0  ;;  %v330_v54 = vpop.f32.mrf.mxu1 }
 0x312   :  { %v311_v53 = vadd.f32 %v374_v51, %v310_v52 }
 0x314   :  { %v331_v55 = vadd.f32 %v330_v54, %v311_v53 }
 0x316   :  { %377 = vtanh.f32 %v331_v55 }
 0x31c   :  { %v378_v56 = vpop.eup %377 }
 0x31d   :  { %335 = vst.msk [vmem:[#allocation3] sm:$0xff] %vm334_vm4, %v378_v56 }
 0x31e   :  { %341 = vst.msk [vmem:[#allocation3] sm:$0xff] %vm340_vm5, %v338_v57 }
 0x31f   :  { %347 = vst.msk [vmem:[#allocation3] sm:$0xff] %vm346_vm6, %v344_v58 }
 0x320   :  { %358 = dma.vmem_to_hbm [thread:$0]  %s354_s8, 128, %s356_s22, [#allocation4]  }
 0x321   :  { %403 = dma.done.wait [#allocation4], 128  }
 0x322   :  { %404 = vsyncadd [#allocation4], 4294967168 }
 0x323   :  { %363 = vsyncpa [#allocation4], 1 }

</bundles_post_ra>
